<compile_context>
chip_gen: v6e
topology: v6e:2x2x1
jax: 0.10.0
libtpu: 0.0.40
codegen_flags: <defaults>
</compile_context>

<pallas_src>
import numpy as np
import jax
import jax.numpy as jnp
from jax.experimental import pallas as pl
from jax.experimental.pallas import tpu as pltpu


def _num_groups(rows, channels):
    """Grid steps: 2 parallel blocks only if each keeps a full 8-sublane tile and
    whole samples (v7x megacore); otherwise one step (v5e/v6e: 1 TC, the grid is
    a serial loop and per-step overhead dominates at these sizes)."""
    if rows % 16 == 0 and (rows // 2) % channels == 0:
        return 2
    return 1


def _conv_vpu(wbig, x):
    """y = wbig @ x via unrolled VPU broadcast multiply-adds.
    wbig: (rows, rows) block-diagonal kron(I_nb, w); x: (rows, HW).
    rows is tiny (<=16), so this is a handful of VPU bundles — no MXU drain."""
    rows = x.shape[0]
    y = wbig[:, 0:1] * x[0:1, :]
    for k in range(1, rows):
        y = y + wbig[:, k:k + 1] * x[k:k + 1, :]
    return y


# --------------------------------------------------------------------------
# q_sample: x_t = sqrt(alpha_bar[t]) * x0 + sqrt(1 - alpha_bar[t]) * eps
# Whole batch as one (B*C, HW) dense tile; per-row scales as (B*C, 1) columns.
# --------------------------------------------------------------------------
def _q_sample_kernel(sab_ref, svar_ref, x0_ref, eps_ref, out_ref):
    x0 = x0_ref[...].astype(jnp.float32)
    eps = eps_ref[...].astype(jnp.float32)
    out_ref[...] = (sab_ref[...] * x0 + svar_ref[...] * eps).astype(out_ref.dtype)


# --------------------------------------------------------------------------
# Stand-in eps_model (the real UNetModel is external to VanillaDiffusion):
# 1x1 conv over channels (VPU, block-diagonal weight) + fused additive term
# (bias + context projection + time embedding, precomputed in the wrapper).
# --------------------------------------------------------------------------
def _eps_model_kernel(x_ref, wbig_ref, add_ref, out_ref):
    x = x_ref[...].astype(jnp.float32)                      # (rows, HW)
    y = _conv_vpu(wbig_ref[...], x)                         # (rows, HW)
    out_ref[...] = (y + add_ref[...]).astype(out_ref.dtype)


# --------------------------------------------------------------------------
# Fused loss kernel: q_sample -> eps_model -> squared-error partial sum.
# xt / eps_theta never leave VMEM; partial sum written as one SMEM scalar.
# --------------------------------------------------------------------------
def _loss_kernel(x0_ref, noise_ref, sab_ref, svar_ref, wbig_ref, add_ref, out_ref):
    x0 = x0_ref[...].astype(jnp.float32)
    eps = noise_ref[...].astype(jnp.float32)
    xt = sab_ref[...] * x0 + svar_ref[...] * eps            # q_sample (f32)
    y = _conv_vpu(wbig_ref[...], xt)                        # (rows, HW)
    eps_theta = y + add_ref[...]
    d = eps - eps_theta
    out_ref[0, 0] = jnp.sum(d * d)                          # one scalar per step


# --------------------------------------------------------------------------
# VanillaDiffusion (Pallas)
# --------------------------------------------------------------------------
class VanillaDiffusionPallas:
    def __init__(self, n_steps, linear_start, linear_end, channels, d_cond, key):
        self.n_steps = n_steps
        self.channels = channels
        # Schedule built in float64 (numpy) then cast to float32, exactly like PyTorch.
        beta64 = np.linspace(linear_start ** 0.5, linear_end ** 0.5, n_steps,
                             dtype=np.float64) ** 2
        alpha64 = 1.0 - beta64
        alpha_bar64 = np.cumprod(alpha64)
        self.beta = jnp.asarray(beta64, dtype=jnp.float32)
        self.alpha = jnp.asarray(alpha64, dtype=jnp.float32)
        self.alpha_bar = jnp.asarray(alpha_bar64, dtype=jnp.float32)
        self.sigma2 = self.beta
        self.sqrt_alpha_bar = jnp.sqrt(self.alpha_bar)
        self.sqrt_one_minus_alpha_bar = jnp.sqrt(1.0 - self.alpha_bar)

        # TODO(synk): the real UNetModel eps_model is defined outside this module;
        # a deterministic 1x1-conv + context/time-embedding stand-in is used here.
        k1, k2, k3, k4 = jax.random.split(key, 4)
        C = channels
        self.w = 0.1 * jax.random.normal(k1, (C, C), jnp.float32)
        self.bias = 0.1 * jax.random.normal(k2, (C,), jnp.float32)
        self.wctx = 0.1 * jax.random.normal(k3, (C, d_cond), jnp.float32)
        self.temb_table = 0.1 * jax.random.normal(k4, (n_steps, C), jnp.float32)

    # ---- wrapper helpers -------------------------------------------------
    def _fused_add(self, t, context):
        """bias + Wctx @ mean(context) + temb[t]  ->  (B*C, 1) column (f32)."""
        C = self.channels
        ctx_mean = jnp.mean(context, axis=1)                        # (B, D)
        add = (self.bias.reshape(1, C)
               + ctx_mean @ self.wctx.T
               + self.temb_table[t])                                # (B, C)
        return add.reshape(-1, 1).astype(jnp.float32)               # (B*C, 1)

    def _block_weight(self, rows_per_block):
        nb = rows_per_block // self.channels
        return jnp.kron(jnp.eye(nb, dtype=jnp.float32), self.w)     # (rb, rb)

    # forward(x, t, context) == eps_model(x, t, context)
    def forward(self, x, t, context):
        B, C, H, W = x.shape
        HW = H * W
        rows = B * C
        G = _num_groups(rows, C)
        rb = rows // G
        add_col = self._fused_add(t, context)                       # (rows, 1)
        wbig = self._block_weight(rb)                               # (rb, rb)
        out = pl.pallas_call(
            _eps_model_kernel,
            out_shape=jax.ShapeDtypeStruct((rows, HW), x.dtype),
            grid_spec=pltpu.PrefetchScalarGridSpec(
                num_scalar_prefetch=0,
                grid=(G,),
                in_specs=[
                    pl.BlockSpec((rb, HW), lambda g: (g, 0)),
                    pl.BlockSpec((rb, rb), lambda g: (0, 0)),   # constant: never re-DMA'd
                    pl.BlockSpec((rb, 1), lambda g: (g, 0)),
                ],
                out_specs=pl.BlockSpec((rb, HW), lambda g: (g, 0)),
            ),
            compiler_params=pltpu.CompilerParams(dimension_semantics=("parallel",)),
        )(x.reshape(rows, HW), wbig, add_col)
        return out.reshape(B, C, H, W)

    __call__ = forward

    def q_xt_x0(self, x0, t):
        ab = self.alpha_bar[t].reshape(-1, 1, 1, 1)
        return ab ** 0.5 * x0, 1.0 - ab

    def q_sample(self, x0, t, eps):
        B, C, H, W = x0.shape
        HW = H * W
        rows = B * C
        G = _num_groups(rows, C)
        rb = rows // G
        sab_col = jnp.repeat(self.sqrt_alpha_bar[t], C).reshape(rows, 1)
        svar_col = jnp.repeat(self.sqrt_one_minus_alpha_bar[t], C).reshape(rows, 1)
        out = pl.pallas_call(
            _q_sample_kernel,
            out_shape=jax.ShapeDtypeStruct((rows, HW), x0.dtype),
            grid_spec=pltpu.PrefetchScalarGridSpec(
                num_scalar_prefetch=0,
                grid=(G,),
                in_specs=[
                    pl.BlockSpec((rb, 1), lambda g: (g, 0)),
                    pl.BlockSpec((rb, 1), lambda g: (g, 0)),
                    pl.BlockSpec((rb, HW), lambda g: (g, 0)),
                    pl.BlockSpec((rb, HW), lambda g: (g, 0)),
                ],
                out_specs=pl.BlockSpec((rb, HW), lambda g: (g, 0)),
            ),
            compiler_params=pltpu.CompilerParams(dimension_semantics=("parallel",)),
        )(sab_col, svar_col, x0.reshape(rows, HW), eps.reshape(rows, HW))
        return out.reshape(B, C, H, W)

    # TODO(synk): p_sample (ancestral sampling step) needs an RNG key for the
    # added noise; the 50-step sampling loop should eventually be one fused
    # pallas_call (x resident in VMEM, noise via pltpu.prng_random_bits).

    def loss(self, x0, cond, noise, t):
        # TODO(synk): PyTorch samples t (and optionally noise) internally; they
        # are explicit args here for determinism.
        B, C, H, W = x0.shape
        HW = H * W
        rows = B * C
        G = _num_groups(rows, C)
        rb = rows // G
        sab_col = jnp.repeat(self.sqrt_alpha_bar[t], C).reshape(rows, 1)
        svar_col = jnp.repeat(self.sqrt_one_minus_alpha_bar[t], C).reshape(rows, 1)
        add_col = self._fused_add(t, cond)                          # (rows, 1)
        wbig = self._block_weight(rb)                               # (rb, rb)
        partials = pl.pallas_call(
            _loss_kernel,
            out_shape=jax.ShapeDtypeStruct((G, 1), jnp.float32),
            grid_spec=pltpu.PrefetchScalarGridSpec(
                num_scalar_prefetch=0,
                grid=(G,),
                in_specs=[
                    pl.BlockSpec((rb, HW), lambda g: (g, 0)),   # x0
                    pl.BlockSpec((rb, HW), lambda g: (g, 0)),   # noise
                    pl.BlockSpec((rb, 1), lambda g: (g, 0)),    # sqrt(alpha_bar)[t]
                    pl.BlockSpec((rb, 1), lambda g: (g, 0)),    # sqrt(1-alpha_bar)[t]
                    pl.BlockSpec((rb, rb), lambda g: (0, 0)),   # block-diag weight
                    pl.BlockSpec((rb, 1), lambda g: (g, 0)),    # fused additive term
                ],
                out_specs=pl.BlockSpec((1, 1), lambda g: (g, 0),
                                       memory_space=pltpu.MemorySpace.SMEM),
            ),
            compiler_params=pltpu.CompilerParams(dimension_semantics=("parallel",)),
        )(x0.reshape(rows, HW), noise.reshape(rows, HW),
          sab_col, svar_col, wbig, add_col)
        return jnp.sum(partials) / (rows * HW)


if __name__ == "__main__":
    key = jax.random.PRNGKey(0)
    k_param, k_x, k_ctx, k_noise, k_t = jax.random.split(key, 5)

    B, C, H, W = 2, 4, 16, 16
    S, D = 8, 32
    n_steps = 50

    model = VanillaDiffusionPallas(n_steps, 1e-4, 2e-2, C, D, k_param)

    x = jax.random.normal(k_x, (B, C, H, W), jnp.float32)
    ctx = jax.random.normal(k_ctx, (B, S, D), jnp.float32)
    noise = jax.random.normal(k_noise, (B, C, H, W), jnp.float32)
    t = jax.random.randint(k_t, (B,), 0, n_steps, dtype=jnp.int32)

    # forward (== eps_model(x, t, context))
    eps_theta = model(x, t, ctx)
    jax.block_until_ready(eps_theta)

    # pure-JAX references
    def forward_ref(xx, tt, cc):
        y = jnp.einsum("oc,bchw->bohw", model.w, xx)
        ctxp = jnp.einsum("cd,bd->bc", model.wctx, jnp.mean(cc, axis=1))
        temb = model.temb_table[tt]
        return (y + model.bias.reshape(1, C, 1, 1)
                + ctxp[:, :, None, None] + temb[:, :, None, None])

    ref = forward_ref(x, t, ctx)
    assert jnp.allclose(eps_theta, ref, atol=1e-4, rtol=1e-4)

    xt = model.q_sample(x, t, noise)
    xt_ref = (jnp.sqrt(model.alpha_bar[t]).reshape(-1, 1, 1, 1) * x
              + jnp.sqrt(1.0 - model.alpha_bar[t]).reshape(-1, 1, 1, 1) * noise)
    assert jnp.allclose(xt, xt_ref, atol=1e-5, rtol=1e-5)

    l = model.loss(x, ctx, noise, t)
    jax.block_until_ready(l)
    l_ref = jnp.mean((noise - forward_ref(xt_ref, t, ctx)) ** 2)
    assert jnp.allclose(l, l_ref, atol=1e-4, rtol=1e-4)

    print("KERNEL_OK")
</pallas_src>

<mosaic_0001>
module attributes {stable_mosaic.version = 11 : i64} {
  func.func @_eps_model_kernel(%arg0: i32, %arg1: memref<8x256xf32, #tpu.memory_space<vmem>>, %arg2: memref<8x8xf32, #tpu.memory_space<vmem>>, %arg3: memref<8x1xf32, #tpu.memory_space<vmem>>, %arg4: memref<8x256xf32, #tpu.memory_space<vmem>>) attributes {dimension_semantics = [#tpu.dimension_semantics<parallel>], iteration_bounds = array<i64: 1>, scalar_prefetch = 0 : i64, scratch_operands = 0 : i64, tpu.core_type = #tpu.core_type<tc>, window_params = [{transform_indices = @transform_0, window_bounds = array<i64: 8, 256>}, {pipeline_mode = #tpu.pipeline_mode<synchronous>, transform_indices = @transform_1, window_bounds = array<i64: 8, 8>}, {transform_indices = @transform_2, window_bounds = array<i64: 8, 1>}, {transform_indices = @transform_3, window_bounds = array<i64: 8, 256>}]} {
    %c0 = arith.constant 0 : index
    %c0_0 = arith.constant 0 : index
    %0 = vector.load %arg1[%c0, %c0_0] : memref<8x256xf32, #tpu.memory_space<vmem>>, vector<8x256xf32>
    %c0_1 = arith.constant 0 : index
    %c0_2 = arith.constant 0 : index
    %1 = vector.load %arg2[%c0_1, %c0_2] : memref<8x8xf32, #tpu.memory_space<vmem>>, vector<8x8xf32>
    %2 = vector.extract_strided_slice %1 {offsets = [0, 0], sizes = [8, 1], strides = [1, 1]} : vector<8x8xf32> to vector<8x1xf32>
    %3 = vector.extract_strided_slice %0 {offsets = [0, 0], sizes = [1, 256], strides = [1, 1]} : vector<8x256xf32> to vector<1x256xf32>
    %4 = vector.broadcast %2 : vector<8x1xf32> to vector<8x256xf32>
    %5 = vector.broadcast %3 : vector<1x256xf32> to vector<8x256xf32>
    %6 = arith.mulf %4, %5 : vector<8x256xf32>
    %7 = vector.extract_strided_slice %1 {offsets = [0, 1], sizes = [8, 1], strides = [1, 1]} : vector<8x8xf32> to vector<8x1xf32>
    %8 = vector.extract_strided_slice %0 {offsets = [1, 0], sizes = [1, 256], strides = [1, 1]} : vector<8x256xf32> to vector<1x256xf32>
    %9 = vector.broadcast %7 : vector<8x1xf32> to vector<8x256xf32>
    %10 = vector.broadcast %8 : vector<1x256xf32> to vector<8x256xf32>
    %11 = arith.mulf %9, %10 : vector<8x256xf32>
    %12 = arith.addf %6, %11 : vector<8x256xf32>
    %13 = vector.extract_strided_slice %1 {offsets = [0, 2], sizes = [8, 1], strides = [1, 1]} : vector<8x8xf32> to vector<8x1xf32>
    %14 = vector.extract_strided_slice %0 {offsets = [2, 0], sizes = [1, 256], strides = [1, 1]} : vector<8x256xf32> to vector<1x256xf32>
    %15 = vector.broadcast %13 : vector<8x1xf32> to vector<8x256xf32>
    %16 = vector.broadcast %14 : vector<1x256xf32> to vector<8x256xf32>
    %17 = arith.mulf %15, %16 : vector<8x256xf32>
    %18 = arith.addf %12, %17 : vector<8x256xf32>
    %19 = vector.extract_strided_slice %1 {offsets = [0, 3], sizes = [8, 1], strides = [1, 1]} : vector<8x8xf32> to vector<8x1xf32>
    %20 = vector.extract_strided_slice %0 {offsets = [3, 0], sizes = [1, 256], strides = [1, 1]} : vector<8x256xf32> to vector<1x256xf32>
    %21 = vector.broadcast %19 : vector<8x1xf32> to vector<8x256xf32>
    %22 = vector.broadcast %20 : vector<1x256xf32> to vector<8x256xf32>
    %23 = arith.mulf %21, %22 : vector<8x256xf32>
    %24 = arith.addf %18, %23 : vector<8x256xf32>
    %25 = vector.extract_strided_slice %1 {offsets = [0, 4], sizes = [8, 1], strides = [1, 1]} : vector<8x8xf32> to vector<8x1xf32>
    %26 = vector.extract_strided_slice %0 {offsets = [4, 0], sizes = [1, 256], strides = [1, 1]} : vector<8x256xf32> to vector<1x256xf32>
    %27 = vector.broadcast %25 : vector<8x1xf32> to vector<8x256xf32>
    %28 = vector.broadcast %26 : vector<1x256xf32> to vector<8x256xf32>
    %29 = arith.mulf %27, %28 : vector<8x256xf32>
    %30 = arith.addf %24, %29 : vector<8x256xf32>
    %31 = vector.extract_strided_slice %1 {offsets = [0, 5], sizes = [8, 1], strides = [1, 1]} : vector<8x8xf32> to vector<8x1xf32>
    %32 = vector.extract_strided_slice %0 {offsets = [5, 0], sizes = [1, 256], strides = [1, 1]} : vector<8x256xf32> to vector<1x256xf32>
    %33 = vector.broadcast %31 : vector<8x1xf32> to vector<8x256xf32>
    %34 = vector.broadcast %32 : vector<1x256xf32> to vector<8x256xf32>
    %35 = arith.mulf %33, %34 : vector<8x256xf32>
    %36 = arith.addf %30, %35 : vector<8x256xf32>
    %37 = vector.extract_strided_slice %1 {offsets = [0, 6], sizes = [8, 1], strides = [1, 1]} : vector<8x8xf32> to vector<8x1xf32>
    %38 = vector.extract_strided_slice %0 {offsets = [6, 0], sizes = [1, 256], strides = [1, 1]} : vector<8x256xf32> to vector<1x256xf32>
    %39 = vector.broadcast %37 : vector<8x1xf32> to vector<8x256xf32>
    %40 = vector.broadcast %38 : vector<1x256xf32> to vector<8x256xf32>
    %41 = arith.mulf %39, %40 : vector<8x256xf32>
    %42 = arith.addf %36, %41 : vector<8x256xf32>
    %43 = vector.extract_strided_slice %1 {offsets = [0, 7], sizes = [8, 1], strides = [1, 1]} : vector<8x8xf32> to vector<8x1xf32>
    %44 = vector.extract_strided_slice %0 {offsets = [7, 0], sizes = [1, 256], strides = [1, 1]} : vector<8x256xf32> to vector<1x256xf32>
    %45 = vector.broadcast %43 : vector<8x1xf32> to vector<8x256xf32>
    %46 = vector.broadcast %44 : vector<1x256xf32> to vector<8x256xf32>
    %47 = arith.mulf %45, %46 : vector<8x256xf32>
    %48 = arith.addf %42, %47 : vector<8x256xf32>
    %c0_3 = arith.constant 0 : index
    %c0_4 = arith.constant 0 : index
    %49 = vector.load %arg3[%c0_3, %c0_4] : memref<8x1xf32, #tpu.memory_space<vmem>>, vector<8x1xf32>
    %50 = vector.broadcast %49 : vector<8x1xf32> to vector<8x256xf32>
    %51 = arith.addf %48, %50 : vector<8x256xf32>
    %c0_5 = arith.constant 0 : index
    %c0_6 = arith.constant 0 : index
    %52 = vector.load %arg4[%c0_5, %c0_6] : memref<8x256xf32, #tpu.memory_space<vmem>>, vector<8x256xf32>
    tpu.vector_store %arg4[%c0_5, %c0_6], %51 {strides = array<i32>} : memref<8x256xf32, #tpu.memory_space<vmem>>, vector<8x256xf32>,
    return
  }
  func.func @transform_0(%arg0: i32) -> (i32, i32) {
    %c0_i32 = arith.constant 0 : i32
    %c0_i32_0 = arith.constant 0 : i32
    return %arg0, %c0_i32 : i32, i32
  }
  func.func @transform_1(%arg0: i32) -> (i32, i32) {
    %c0_i32 = arith.constant 0 : i32
    %c0_i32_0 = arith.constant 0 : i32
    %c0_i32_1 = arith.constant 0 : i32
    return %c0_i32, %c0_i32_0 : i32, i32
  }
  func.func @transform_2(%arg0: i32) -> (i32, i32) {
    %c0_i32 = arith.constant 0 : i32
    %c0_i32_0 = arith.constant 0 : i32
    return %arg0, %c0_i32 : i32, i32
  }
  func.func @transform_3(%arg0: i32) -> (i32, i32) {
    %c0_i32 = arith.constant 0 : i32
    %c0_i32_0 = arith.constant 0 : i32
    return %arg0, %c0_i32 : i32, i32
  }
}

</mosaic_0001>

<bundles_post_ra>
// kernel: tpu_custom_call.1
= control target key start
LH: loop header
LB: loop body
LE: loop exit
PB: predicated region body
PF: predicated region fallthrough
CT: control target
= control target key end

     0   :  { %8 = vsyncpa [#allocation3], 0  ;;  %s287_s0 = inlined_call_operand.hbm [shape: f32[8,256], index: 0, kind: input, shape index: {}]   ;;  %s288_s1 = inlined_call_operand.vmem [shape: f32[8,8], index: 1, kind: input, shape index: {}]   ;;  %s289_s2 = inlined_call_operand.vmem [shape: f32[8,1], index: 2, kind: input, shape index: {}]   ;;  %s290_s3 = inlined_call_operand.hbm [shape: f32[8,256], index: 3, kind: output, shape index: {}]  }
   0x1   :  { %9 = vsyncpa [#allocation4], 0  ;;  %s245_s12 = smov [#allocation2]  }
   0x2   :  { %s16_s13 = sshll.u32 %s245_s12, 4  ;;  %s17_s13 = int_to_ptr.vmem [resolvable:$true] %s16_s13 }
   0x3   :  { %s209_s14 = scalar_lea.vmem %s17_s13, 256  ;;  %p214_p1 = scmp.lt.s32.totalorder %s17_s13, %s17_s13 }
   0x4   :  { %p210_p0 = scmp.ne.s32.totalorder %s17_s13, %s209_s14  ;;  %p215_p2 = scmp.lt.s32.totalorder %s209_s14, %s209_s14 }
   0x6   :  { %p216_p3 = por %p215_p2, %p214_p1 }
   0x8   :  { %p217_p4 = pnand %p216_p3, %p210_p0 }
   0xa   :  { %220 = shalt.err (!%p217_p4)
}
   0xb   :  { %19 = dma.hbm_to_vmem [thread:$0]  %s287_s0, 256, %s17_s13, [#allocation3]  }
   0xc   :  { %241 = dma.done.wait [#allocation3], 256  }
   0xd   :  { %242 = vsyncadd [#allocation3], 4294967040  ;;  %v246_v0 = vmov 2   ;;  %v247_v1 = vmov 0   ;;  %v29_v2 = vld [vmem:[%s288_s1] sm:$0xff]  ;;  %v248_v3 = vmov 3   ;;  %v35_v10 = vlaneseq }
   0xe   :  { %194 = vset.pattern.permute.xlu1 %v246_v0  ;;  %192 = vset.pattern.permute.xlu0 %v247_v1  ;;  %v249_v4 = vmov 1   ;;  %v250_v5 = vmov 4   ;;  %v251_v6 = vmov 5   ;;  %v157_v7 = vld [vmem:[%s289_s2] sm:$0xff]  ;;  %v252_v8 = vmov 6   ;;  %v28_v18 = vld [vmem:[#allocation2 + $0x8] sm:$0xff] }
   0xf   :  { %62 = vperm.xlu1 %194, %v29_v2   ;;  %32 = vperm.xlu0 %192, %v29_v2   ;;  %v253_v9 = vmov 7   ;;  %v36_v11 = vshrl.u32 %v35_v10, 7  ;;  %v27_v17 = vld [vmem:[#allocation2] sm:$0xff]  ;;  %s254_s1 = smov [#allocation5]  }
  0x10   :  { %s173_s2 = sshll.u32 %s254_s1, 4  ;;  %s174_s2 = int_to_ptr.vmem [resolvable:$true] %s173_s2 }
  0x11   :  { %v37_v12 = vsub.s32 0, %v36_v11  ;;  %v51_v13 = vsub.s32 1, %v36_v11  ;;  %v67_v14 = vsub.s32 2, %v36_v11  ;;  %v83_v19 = vsub.s32 3, %v36_v11  ;;  %s221_s20 = scalar_lea.vmem %s174_s2, 256  ;;  %p226_p6 = scmp.lt.s32.totalorder %s174_s2, %s174_s2 }
  0x12   :  { %v99_v24 = vsub.s32 4, %v36_v11  ;;  %v115_v31 = vsub.s32 5, %v36_v11  ;;  %v131_v44 = vsub.s32 6, %v36_v11  ;;  %v147_v55 = vsub.s32 7, %v36_v11  ;;  %p222_p5 = scmp.ne.s32.totalorder %s174_s2, %s221_s20  ;;  %p227_p7 = scmp.lt.s32.totalorder %s221_s20, %s221_s20 }
  0x13   :  { %195 = vset.pattern.permute.xlu1 %v248_v3  ;;  %193 = vset.pattern.permute.xlu0 %v249_v4  ;;  %v38_v20 = vrot.slane %v27_v17, %v37_v12  ;;  %v42_v21 = vrot.slane %v28_v18, %v37_v12  ;;  %v52_v22 = vrot.slane %v27_v17, %v51_v13 }
  0x14   :  { %78 = vperm.xlu1 %195, %v29_v2   ;;  %46 = vperm.xlu0 %193, %v29_v2   ;;  %v56_v23 = vrot.slane %v28_v18, %v51_v13  ;;  %v68_v25 = vrot.slane %v27_v17, %v67_v14  ;;  %v72_v26 = vrot.slane %v28_v18, %v67_v14  ;;  %p228_p8 = por %p227_p7, %p226_p6 }
  0x15   :  { %v84_v28 = vrot.slane %v27_v17, %v83_v19  ;;  %v88_v29 = vrot.slane %v28_v18, %v83_v19  ;;  %v100_v36 = vrot.slane %v27_v17, %v99_v24  ;;  %v104_v37 = vrot.slane %v28_v18, %v99_v24 }
  0x16   :  { %v116_v42 = vrot.slane %v27_v17, %v115_v31  ;;  %v120_v43 = vrot.slane %v28_v18, %v115_v31  ;;  %v132_v58 = vrot.slane %v27_v17, %v131_v44  ;;  %v136_v59 = vrot.slane %v28_v18, %v131_v44  ;;  %p229_p9 = pnand %p228_p8, %p222_p5 }
  0x17   :  { %v148_v63 = vrot.slane %v27_v17, %v147_v55  ;;  %v152_v0 = vrot.slane %v28_v18, %v147_v55 }
  0x18   :  { %196 = vset.pattern.permute.xlu1 %v250_v5  ;;  %197 = vset.pattern.permute.xlu0 %v251_v6 }
  0x19   :  { %94 = vperm.xlu1 %196, %v29_v2   ;;  %110 = vperm.xlu0 %197, %v29_v2  }
  0x1d   :  { %198 = vset.pattern.permute.xlu1 %v252_v8  ;;  %200 = vset.pattern.permute.xlu0 %v247_v1 }
  0x1e   :  { %126 = vperm.xlu1 %198, %v29_v2   ;;  %160 = vperm.xlu0 %200, %v157_v7  }
  0x22   :  { %199 = vset.pattern.permute.xlu1 %v253_v9 }
  0x23   :  { %142 = vperm.xlu1 %199, %v29_v2  }
  0x8a   :  { %v63_v15 = vpop.permute.xlu1 %62  ;;  %v33_v16 = vpop.permute.xlu0 %32 }
  0x8b   :  { %v43_v32 = vmul.f32 %v38_v20, %v33_v16  ;;  %v44_v33 = vmul.f32 %v42_v21, %v33_v16  ;;  %v73_v38 = vmul.f32 %v68_v25, %v63_v15  ;;  %v74_v39 = vmul.f32 %v72_v26, %v63_v15 }
  0x8f   :  { %v79_v27 = vpop.permute.xlu1 %78  ;;  %v47_v30 = vpop.permute.xlu0 %46 }
  0x90   :  { %v57_v34 = vmul.f32 %v52_v22, %v47_v30  ;;  %v58_v35 = vmul.f32 %v56_v23, %v47_v30  ;;  %v89_v45 = vmul.f32 %v84_v28, %v79_v27  ;;  %v90_v46 = vmul.f32 %v88_v29, %v79_v27 }
  0x92   :  { %v59_v40 = vadd.f32 %v57_v34, %v43_v32  ;;  %v60_v41 = vadd.f32 %v58_v35, %v44_v33 }
  0x94   :  { %v75_v47 = vadd.f32 %v73_v38, %v59_v40  ;;  %v76_v48 = vadd.f32 %v74_v39, %v60_v41  ;;  %v95_v49 = vpop.permute.xlu1 %94  ;;  %v111_v50 = vpop.permute.xlu0 %110 }
  0x95   :  { %v105_v51 = vmul.f32 %v100_v36, %v95_v49  ;;  %v106_v52 = vmul.f32 %v104_v37, %v95_v49  ;;  %v121_v56 = vmul.f32 %v116_v42, %v111_v50  ;;  %v122_v57 = vmul.f32 %v120_v43, %v111_v50 }
  0x96   :  { %v91_v53 = vadd.f32 %v89_v45, %v75_v47  ;;  %v92_v54 = vadd.f32 %v90_v46, %v76_v48 }
  0x98   :  { %v107_v60 = vadd.f32 %v105_v51, %v91_v53  ;;  %v108_v61 = vadd.f32 %v106_v52, %v92_v54 }
  0x99   :  { %v127_v62 = vpop.permute.xlu1 %126  ;;  %v161_v10 = vpop.permute.xlu0 %160 }
  0x9a   :  { %v123_v1 = vadd.f32 %v121_v56, %v107_v60  ;;  %v124_v2 = vadd.f32 %v122_v57, %v108_v61  ;;  %v137_v3 = vmul.f32 %v132_v58, %v127_v62  ;;  %v138_v4 = vmul.f32 %v136_v59, %v127_v62 }
  0x9c   :  { %v139_v6 = vadd.f32 %v137_v3, %v123_v1  ;;  %v140_v7 = vadd.f32 %v138_v4, %v124_v2 }
  0x9e   :  { %v143_v5 = vpop.permute.xlu1 %142 }
  0x9f   :  { %v153_v8 = vmul.f32 %v148_v63, %v143_v5  ;;  %v154_v9 = vmul.f32 %v152_v0, %v143_v5 }
  0xa1   :  { %v155_v11 = vadd.f32 %v153_v8, %v139_v6  ;;  %v156_v12 = vadd.f32 %v154_v9, %v140_v7 }
  0xa3   :  { %v163_v13 = vadd.f32 %v161_v10, %v155_v11  ;;  %v164_v14 = vadd.f32 %v161_v10, %v156_v12 }
  0xa5   :  { %165 = vst [vmem:[#allocation5] sm:$0xff] %v163_v13  ;;  %166 = vst [vmem:[#allocation5 + $0x8] sm:$0xff] %v164_v14 }
  0xa6   :  { %232 = shalt.err (!%p229_p9)
}
  0xa7   :  { %176 = dma.vmem_to_hbm [thread:$0]  %s174_s2, 256, %s290_s3, [#allocation4]  }
  0xa8   :  { %243 = dma.done.wait [#allocation4], 256  }
  0xa9   :  { %244 = vsyncadd [#allocation4], 4294967040 }
  0xaa   :  { %180 = vsyncpa [#allocation3], 1 }
  0xab   :  { %181 = vsyncpa [#allocation4], 1 }

</bundles_post_ra>
